<compile_context>
chip_gen: v5e
topology: v5e:2x2
jax: 0.10.0
libtpu: 0.0.40
codegen_flags: <defaults>
</compile_context>

<pallas_src>
import functools
import math

import jax
import jax.numpy as jnp
from jax.experimental import pallas as pl
from jax.experimental.pallas import tpu as pltpu

_LANE = 128
_MAX_SUB_ROWS = 1024        # sublane-row tile cap (~2 MiB f32 logits block @ C=4)


def _vmem_limit_bytes():
    # Generation-aware scoped-VMEM limit: half of physical, capped at 64 MiB
    # (v5e/v6e: 128 MiB physical -> 64 MiB scoped; v7x: 64 MiB physical -> 32 MiB).
    try:
        cap = pltpu.get_tpu_info().vmem_capacity_bytes
        return int(min(cap // 2, 64 * 1024 * 1024))
    except Exception:
        return 32 * 1024 * 1024


_VMEM_LIMIT = _vmem_limit_bytes()


def _pick_sub_tile(rows, channels, itemsize):
    """Sublane-row tile TS.  Whole axis if it fits the per-block budget (always a
    legal block: it equals the array dim), otherwise a bounded multiple of 32
    (valid tiling for f32/bf16 logits and int8 targets).  Never unbounded, so the
    logits block cannot blow v7x's 64 MiB physical VMEM on huge volumes."""
    budget = 8 * 1024 * 1024                      # per logits block (double-buffered)
    cap = budget // (channels * _LANE * itemsize)
    cap = max(32, min(_MAX_SUB_ROWS, (cap // 32) * 32))
    return rows if rows <= cap else cap


def _partition(R, TS):
    """tiles = cdiv(R, TS); split tiles over an extra 'parallel' axis P so both
    v7x TensorCores stay busy even when N == 1 (no-op on single-TC chips)."""
    tiles = -(-R // TS)
    P = 2 if (tiles >= 2 and tiles % 2 == 0) else 1
    return P, tiles // P, tiles


def _prep_inputs(outputs, targets):
    """Flatten spatial dims, pad to a lane multiple (padded pixels are masked in
    the kernel), reshape to lane-dense (N, C, R, 128) / (N, R, 128).  The logits
    dtype is preserved (bf16 activations are NOT upcast before the pallas_call)."""
    N, C = outputs.shape[:2]
    S = math.prod(outputs.shape[2:])
    S_pad = -(-S // _LANE) * _LANE
    R = S_pad // _LANE
    x = outputs.reshape(N, C, S)
    t = targets.reshape(N, S)
    if S_pad != S:
        x = jnp.pad(x, ((0, 0), (0, 0), (0, S_pad - S)))
        t = jnp.pad(t, ((0, 0), (0, S_pad - S)))
    # int8 targets (1 B/pixel); int32 fallback if class ids could exceed 127.
    tdt = jnp.int8 if C <= 127 else jnp.int32
    x = x.reshape(N, C, R, _LANE)                 # free reshape, no HBM transpose
    t = t.reshape(N, R, _LANE).astype(tdt)
    return x, t, N, C, S, S_pad, R


# ----------------------------------------------------------------------------
# CrossEntropy (nn.CrossEntropyLoss with mean reduction)
# ----------------------------------------------------------------------------
def _make_xent_kernel(TS, AS, tiles_per_p, S_true, needs_mask):
    def kernel(logits_ref, tgt_ref, acc_ref):
        @pl.when(pl.program_id(2) == 0)
        def _():
            acc_ref[...] = jnp.zeros_like(acc_ref)

        x = logits_ref[0].astype(jnp.float32)            # (C, TS, 128)
        tgt = tgt_ref[0].astype(jnp.int32)               # (TS, 128)

        # Class-axis reductions stay on the VPU (leading axis, C small & static).
        # Deliberately NOT routed through the MXU (C << 128 contraction dim).
        m = jnp.max(x, axis=0)                           # (TS, 128)
        xs = x - m[None]
        se = jnp.sum(jnp.exp(xs), axis=0)                # (TS, 128)
        cls = jax.lax.broadcasted_iota(jnp.int32, xs.shape, 0)
        tl = jnp.sum(jnp.where(cls == tgt[None], xs, 0.0), axis=0)
        nll = jnp.log(se) - tl                           # per-pixel NLL, (TS, 128)

        if needs_mask:                                   # lane padding / tail tile
            t_g = pl.program_id(1) * tiles_per_p + pl.program_id(2)
            rows = jax.lax.broadcasted_iota(jnp.int32, (TS, _LANE), 0)
            lanes = jax.lax.broadcasted_iota(jnp.int32, (TS, _LANE), 1)
            valid = ((t_g * TS + rows) * _LANE + lanes) < S_true
            nll = jnp.where(valid, nll, 0.0)

        # Full-vreg (8,128) resident accumulator: pure-VPU tree of adds, no
        # per-step cross-sublane reduce, unmasked dense store.
        if AS == 8:
            part = nll.reshape(TS // 8, 8, _LANE).sum(axis=0)     # (8, 128)
        else:
            part = nll.sum(axis=0, keepdims=True)                 # tiny-TS fallback
        acc_ref[...] += part[None, None]
    return kernel


@jax.jit
def cross_entropy_loss(outputs, targets):
    """outputs: (N, C, *spatial) float/bf16, targets: (N, *spatial) int -> scalar."""
    # TODO(synk): torch's default ignore_index=-100 semantics are not honored
    # (all pixels are assumed to carry a valid class id).
    x, t, N, C, S, S_pad, R = _prep_inputs(outputs, targets)
    TS = _pick_sub_tile(R, C, x.dtype.itemsize)
    P, tiles_per_p, tiles = _partition(R, TS)
    AS = 8 if TS % 8 == 0 else 1
    needs_mask = (S_pad != S) or (tiles * TS != R)

    kernel = _make_xent_kernel(TS, AS, tiles_per_p, S, needs_mask)
    cost = pl.CostEstimate(
        flops=4 * C * N * S_pad,
        transcendentals=(C + 1) * N * S_pad,
        bytes_accessed=x.size * x.dtype.itemsize + t.size * t.dtype.itemsize
        + N * P * AS * _LANE * 4)

    acc = pl.pallas_call(
        kernel,
        out_shape=jax.ShapeDtypeStruct((N, P, AS, _LANE), jnp.float32),
        grid_spec=pltpu.PrefetchScalarGridSpec(
            num_scalar_prefetch=0,
            grid=(N, P, tiles_per_p),
            in_specs=[
                pl.BlockSpec((1, C, TS, _LANE),
                             lambda n, p, tt: (n, 0, p * tiles_per_p + tt, 0)),
                pl.BlockSpec((1, TS, _LANE),
                             lambda n, p, tt: (n, p * tiles_per_p + tt, 0)),
            ],
            out_specs=pl.BlockSpec((1, 1, AS, _LANE), lambda n, p, tt: (n, p, 0, 0)),
        ),
        compiler_params=pltpu.CompilerParams(
            # "parallel" axes shard across v7x TensorCores (megacore); if a given
            # toolchain does not shard, swap to pltpu.CORE_PARALLEL on these axes.
            dimension_semantics=("parallel", "parallel", "arbitrary"),
            vmem_limit_bytes=_VMEM_LIMIT),
        cost_estimate=cost,
    )(x, t)

    # glue: tiny final reduce of the per-(sample, split, sublane, lane) partials
    return jnp.sum(acc) / (N * S)


# ----------------------------------------------------------------------------
# DiceLoss (softmax over channels + masked spatial reductions)
# ----------------------------------------------------------------------------
def _make_dice_kernel(C, TS, AS, tiles_per_p, S_true, needs_mask):
    def kernel(logits_ref, tgt_ref, acc_ref):
        @pl.when(pl.program_id(2) == 0)
        def _():
            acc_ref[...] = jnp.zeros_like(acc_ref)

        x = logits_ref[0].astype(jnp.float32)            # (C, TS, 128)
        tgt = tgt_ref[0].astype(jnp.int32)               # (TS, 128)

        # softmax over classes: one EUP reciprocal per voxel instead of C divides
        m = jnp.max(x, axis=0)
        e = jnp.exp(x - m[None])                         # (C, TS, 128)
        denom = jnp.sum(e, axis=0)
        prob = e * pl.reciprocal(denom)[None]            # exact recip; EUP has slack

        cls = jax.lax.broadcasted_iota(jnp.int32, prob.shape, 0)
        onehot = (cls == tgt[None]).astype(jnp.float32)
        num_c = onehot * prob                            # per-voxel numerator terms
        den_c = onehot + prob                            # per-voxel denominator terms

        if needs_mask:                                   # lane padding / tail tile
            t_g = pl.program_id(1) * tiles_per_p + pl.program_id(2)
            rows = jax.lax.broadcasted_iota(jnp.int32, (TS, _LANE), 0)
            lanes = jax.lax.broadcasted_iota(jnp.int32, (TS, _LANE), 1)
            valid = ((t_g * TS + rows) * _LANE + lanes) < S_true
            num_c = jnp.where(valid[None], num_c, 0.0)
            den_c = jnp.where(valid[None], den_c, 0.0)

        if AS == 8:
            num_p = num_c.reshape(C, TS // 8, 8, _LANE).sum(axis=1)   # (C, 8, 128)
            den_p = den_c.reshape(C, TS // 8, 8, _LANE).sum(axis=1)
        else:
            num_p = num_c.sum(axis=1, keepdims=True)                  # (C, 1, 128)
            den_p = den_c.sum(axis=1, keepdims=True)
        # One dense (2C, AS, 128) accumulator update per step instead of 2C
        # separate masked sub-vreg read-modify-writes (key on v5e's single vst slot).
        acc_ref[...] += jnp.concatenate([num_p, den_p], axis=0)[None, None]
    return kernel


@functools.partial(jax.jit, static_argnums=(2, 3))
def dice_loss(outputs, targets, num_classes=4, target_class="all"):
    """outputs: (N, C, D, H, W) float/bf16, targets: (N, D, H, W) int -> scalar."""
    if num_classes == 4 and target_class != "all":
        # TODO(synk): the 'RV'/'LV' partial-class variants broadcast-mismatch in the
        # torch reference (2-channel mask * 4-channel probability); only 'all' is
        # well-defined, so only 'all' is implemented.
        raise NotImplementedError("only target_class='all' is supported")

    x, t, N, C, S, S_pad, R = _prep_inputs(outputs, targets)
    assert C == num_classes
    TS = _pick_sub_tile(R, C, x.dtype.itemsize)
    P, tiles_per_p, tiles = _partition(R, TS)
    AS = 8 if TS % 8 == 0 else 1
    needs_mask = (S_pad != S) or (tiles * TS != R)

    kernel = _make_dice_kernel(C, TS, AS, tiles_per_p, S, needs_mask)
    cost = pl.CostEstimate(
        flops=6 * C * N * S_pad,
        transcendentals=(C + 1) * N * S_pad,
        bytes_accessed=x.size * x.dtype.itemsize + t.size * t.dtype.itemsize
        + N * P * 2 * C * AS * _LANE * 4)

    acc = pl.pallas_call(
        kernel,
        out_shape=jax.ShapeDtypeStruct((N, P, 2 * C, AS, _LANE), jnp.float32),
        grid_spec=pltpu.PrefetchScalarGridSpec(
            num_scalar_prefetch=0,
            grid=(N, P, tiles_per_p),
            in_specs=[
                pl.BlockSpec((1, C, TS, _LANE),
                             lambda n, p, tt: (n, 0, p * tiles_per_p + tt, 0)),
                pl.BlockSpec((1, TS, _LANE),
                             lambda n, p, tt: (n, p * tiles_per_p + tt, 0)),
            ],
            out_specs=pl.BlockSpec((1, 1, 2 * C, AS, _LANE),
                                   lambda n, p, tt: (n, p, 0, 0, 0)),
        ),
        compiler_params=pltpu.CompilerParams(
            dimension_semantics=("parallel", "parallel", "arbitrary"),
            vmem_limit_bytes=_VMEM_LIMIT),
        cost_estimate=cost,
    )(x, t)

    # glue: tiny (N, C) arithmetic identical to the torch reference
    num_nc = jnp.sum(acc[:, :, :num_classes], axis=(1, 3, 4))   # sum(mask * prob)
    den_nc = jnp.sum(acc[:, :, num_classes:], axis=(1, 3, 4))   # sum(mask) + sum(prob)
    loss = 2.0 * jnp.mean(num_nc / den_nc, axis=1)
    return jnp.mean(1.0 - loss)


# ----------------------------------------------------------------------------
# LossFunction wrapper (mirrors the PyTorch module)
# ----------------------------------------------------------------------------
class LossFunction:
    def __init__(self, loss_type="CrossEntropy", num_classes=4, target_class="all"):
        if loss_type not in ("CrossEntropy", "DiceLoss"):
            raise NotImplementedError
        self.loss_type = loss_type
        self.num_classes = num_classes
        self.target_class = target_class

    def __call__(self, outputs, targets):
        if self.loss_type == "CrossEntropy":
            return cross_entropy_loss(outputs, targets)
        return dice_loss(outputs, targets, self.num_classes, self.target_class)


# ----------------------------------------------------------------------------
# Pure-JAX references for correctness checking
# ----------------------------------------------------------------------------
def _ce_ref(outputs, targets):
    logp = jax.nn.log_softmax(outputs.astype(jnp.float32), axis=1)
    picked = jnp.take_along_axis(logp, targets[:, None].astype(jnp.int32), axis=1)[:, 0]
    return -jnp.mean(picked)


def _dice_ref(outputs, targets, num_classes):
    prob = jax.nn.softmax(outputs.astype(jnp.float32), axis=1)
    mask = (targets[:, None] ==
            jnp.arange(num_classes)[None, :, None, None, None]).astype(jnp.float32)
    num = jnp.sum(mask * prob, axis=(2, 3, 4))
    den = jnp.sum(mask, axis=(2, 3, 4)) + jnp.sum(prob, axis=(2, 3, 4))
    loss = 2.0 * jnp.mean(num / den, axis=1)
    return jnp.mean(1.0 - loss)


if __name__ == "__main__":
    key = jax.random.PRNGKey(0)
    ks = jax.random.split(key, 10)

    # --- CrossEntropy, f32, lane-aligned spatial ---
    o1 = jax.random.normal(ks[0], (2, 4, 16, 16), dtype=jnp.float32)
    t1 = jax.random.randint(ks[1], (2, 16, 16), 0, 4, dtype=jnp.int32)
    ce_fn = LossFunction()  # loss_type='CrossEntropy'
    v1 = jax.block_until_ready(ce_fn(o1, t1))
    assert jnp.allclose(v1, _ce_ref(o1, t1), rtol=1e-5, atol=1e-5), v1

    # --- CrossEntropy, f32, non-128-multiple spatial (pad + in-kernel mask path) ---
    o2 = jax.random.normal(ks[2], (2, 4, 9, 9), dtype=jnp.float32)
    t2 = jax.random.randint(ks[3], (2, 9, 9), 0, 4, dtype=jnp.int32)
    v2 = jax.block_until_ready(ce_fn(o2, t2))
    assert jnp.allclose(v2, _ce_ref(o2, t2), rtol=1e-5, atol=1e-5), v2

    # --- CrossEntropy, bf16 logits at the boundary (full-vreg accumulator path) ---
    o3 = jax.random.normal(ks[4], (2, 4, 32, 32), dtype=jnp.float32).astype(jnp.bfloat16)
    t3 = jax.random.randint(ks[5], (2, 32, 32), 0, 4, dtype=jnp.int32)
    v3 = jax.block_until_ready(ce_fn(o3, t3))
    assert jnp.allclose(v3, _ce_ref(o3, t3), rtol=1e-3, atol=1e-3), v3

    # --- DiceLoss, f32, lane-aligned volume ---
    o4 = jax.random.normal(ks[6], (2, 4, 4, 8, 8), dtype=jnp.float32)
    t4 = jax.random.randint(ks[7], (2, 4, 8, 8), 0, 4, dtype=jnp.int32)
    dice_fn = LossFunction(loss_type="DiceLoss", num_classes=4, target_class="all")
    v4 = jax.block_until_ready(dice_fn(o4, t4))
    assert jnp.allclose(v4, _dice_ref(o4, t4, 4), rtol=1e-5, atol=1e-5), v4

    # --- DiceLoss, f32, non-128-multiple volume (pad + in-kernel mask path) ---
    o5 = jax.random.normal(ks[8], (2, 4, 3, 5, 5), dtype=jnp.float32)
    t5 = jax.random.randint(ks[9], (2, 3, 5, 5), 0, 4, dtype=jnp.int32)
    v5 = jax.block_until_ready(dice_fn(o5, t5))
    assert jnp.allclose(v5, _dice_ref(o5, t5, 4), rtol=1e-5, atol=1e-5), v5

    print("KERNEL_OK")
</pallas_src>

<mosaic_0001>
module attributes {stable_mosaic.version = 11 : i64} {
  func.func @kernel(%arg0: i32, %arg1: i32, %arg2: i32, %arg3: memref<1x4x2x128xf32, #tpu.memory_space<vmem>>, %arg4: memref<1x2x128xi8, #tpu.memory_space<vmem>>, %arg5: memref<1x1x1x128xf32, #tpu.memory_space<vmem>>) attributes {dimension_semantics = [#tpu.dimension_semantics<parallel>, #tpu.dimension_semantics<parallel>, #tpu.dimension_semantics<arbitrary>], iteration_bounds = array<i64: 2, 1, 1>, scalar_prefetch = 0 : i64, scratch_operands = 0 : i64, tpu.core_type = #tpu.core_type<tc>, window_params = [{transform_indices = @transform_0, window_bounds = array<i64: 1, 4, 2, 128>}, {transform_indices = @transform_1, window_bounds = array<i64: 1, 2, 128>}, {transform_indices = @transform_2, window_bounds = array<i64: 1, 1, 1, 128>}]} {
    %c0_i32 = arith.constant 0 : i32
    %0 = arith.cmpi eq, %arg2, %c0_i32 : i32
    %1 = arith.extui %0 : i1 to i32
    %c0_i32_0 = arith.constant 0 : i32
    %2 = arith.cmpi ne, %1, %c0_i32_0 : i32
    scf.if %2 {
      %cst_19 = arith.constant 0.000000e+00 : f32
      %29 = vector.broadcast %cst_19 : f32 to vector<1x1x1x128xf32>
      %c0_20 = arith.constant 0 : index
      %c0_21 = arith.constant 0 : index
      %c0_22 = arith.constant 0 : index
      %c0_23 = arith.constant 0 : index
      %30 = vector.load %arg5[%c0_20, %c0_21, %c0_22, %c0_23] : memref<1x1x1x128xf32, #tpu.memory_space<vmem>>, vector<1x1x1x128xf32>
      tpu.vector_store %arg5[%c0_20, %c0_21, %c0_22, %c0_23], %29 {strides = array<i32>} : memref<1x1x1x128xf32, #tpu.memory_space<vmem>>, vector<1x1x1x128xf32>,
    } else {
    }
    %c0 = arith.constant 0 : index
    %c0_1 = arith.constant 0 : index
    %c0_2 = arith.constant 0 : index
    %c0_3 = arith.constant 0 : index
    %3 = vector.load %arg3[%c0, %c0_1, %c0_2, %c0_3] : memref<1x4x2x128xf32, #tpu.memory_space<vmem>>, vector<1x4x2x128xf32>
    %4 = vector.shape_cast %3 : vector<1x4x2x128xf32> to vector<4x2x128xf32>
    %c0_4 = arith.constant 0 : index
    %c0_5 = arith.constant 0 : index
    %c0_6 = arith.constant 0 : index
    %5 = vector.load %arg4[%c0_4, %c0_5, %c0_6] : memref<1x2x128xi8, #tpu.memory_space<vmem>>, vector<1x2x128xi8>
    %6 = vector.shape_cast %5 : vector<1x2x128xi8> to vector<2x128xi8>
    %7 = arith.extsi %6 : vector<2x128xi8> to vector<2x128xi32>
    %cst = arith.constant dense<0xFF800000> : vector<2x128xf32>
    %8 = vector.multi_reduction <maximumf>, %4, %cst [0] : vector<4x2x128xf32> to vector<2x128xf32>
    %9 = vector.shape_cast %8 : vector<2x128xf32> to vector<1x2x128xf32>
    %10 = vector.broadcast %9 : vector<1x2x128xf32> to vector<4x2x128xf32>
    %11 = arith.subf %4, %10 : vector<4x2x128xf32>
    %12 = math.exp %11 : vector<4x2x128xf32>
    %cst_7 = arith.constant dense<0.000000e+00> : vector<2x128xf32>
    %13 = vector.multi_reduction <add>, %12, %cst_7 [0] : vector<4x2x128xf32> to vector<2x128xf32>
    %14 = tpu.iota {dimensions = array<i32: 0>} : vector<4x2x128xi32>
    %15 = vector.shape_cast %7 : vector<2x128xi32> to vector<1x2x128xi32>
    %16 = vector.broadcast %15 : vector<1x2x128xi32> to vector<4x2x128xi32>
    %17 = arith.cmpi eq, %14, %16 : vector<4x2x128xi32>
    %cst_8 = arith.constant 0.000000e+00 : f32
    %18 = vector.broadcast %cst_8 : f32 to vector<4x2x128xf32>
    %19 = arith.select %17, %11, %18 : vector<4x2x128xi1>, vector<4x2x128xf32>
    %cst_9 = arith.constant dense<0.000000e+00> : vector<2x128xf32>
    %20 = vector.multi_reduction <add>, %19, %cst_9 [0] : vector<4x2x128xf32> to vector<2x128xf32>
    %21 = math.log %13 : vector<2x128xf32>
    %22 = arith.subf %21, %20 : vector<2x128xf32>
    %cst_10 = arith.constant dense<0.000000e+00> : vector<128xf32>
    %23 = vector.multi_reduction <add>, %22, %cst_10 [0] : vector<2x128xf32> to vector<128xf32>
    %24 = vector.shape_cast %23 : vector<128xf32> to vector<1x128xf32>
    %c0_11 = arith.constant 0 : index
    %c0_12 = arith.constant 0 : index
    %c0_13 = arith.constant 0 : index
    %c0_14 = arith.constant 0 : index
    %25 = vector.load %arg5[%c0_11, %c0_12, %c0_13, %c0_14] : memref<1x1x1x128xf32, #tpu.memory_space<vmem>>, vector<1x1x1x128xf32>
    %26 = vector.shape_cast %24 : vector<1x128xf32> to vector<1x1x1x128xf32>
    %27 = arith.addf %25, %26 : vector<1x1x1x128xf32>
    %c0_15 = arith.constant 0 : index
    %c0_16 = arith.constant 0 : index
    %c0_17 = arith.constant 0 : index
    %c0_18 = arith.constant 0 : index
    %28 = vector.load %arg5[%c0_15, %c0_16, %c0_17, %c0_18] : memref<1x1x1x128xf32, #tpu.memory_space<vmem>>, vector<1x1x1x128xf32>
    tpu.vector_store %arg5[%c0_15, %c0_16, %c0_17, %c0_18], %27 {strides = array<i32>} : memref<1x1x1x128xf32, #tpu.memory_space<vmem>>, vector<1x1x1x128xf32>,
    return
  }
  func.func @transform_0(%arg0: i32, %arg1: i32, %arg2: i32) -> (i32, i32, i32, i32) {
    %c1_i32 = arith.constant 1 : i32
    %0 = arith.muli %arg1, %c1_i32 : i32
    %1 = arith.addi %0, %arg2 : i32
    %c0_i32 = arith.constant 0 : i32
    %c0_i32_0 = arith.constant 0 : i32
    %c0_i32_1 = arith.constant 0 : i32
    return %arg0, %c0_i32, %1, %c0_i32_0 : i32, i32, i32, i32
  }
  func.func @transform_1(%arg0: i32, %arg1: i32, %arg2: i32) -> (i32, i32, i32) {
    %c1_i32 = arith.constant 1 : i32
    %0 = arith.muli %arg1, %c1_i32 : i32
    %1 = arith.addi %0, %arg2 : i32
    %c0_i32 = arith.constant 0 : i32
    %c0_i32_0 = arith.constant 0 : i32
    return %arg0, %1, %c0_i32 : i32, i32, i32
  }
  func.func @transform_2(%arg0: i32, %arg1: i32, %arg2: i32) -> (i32, i32, i32, i32) {
    %c0_i32 = arith.constant 0 : i32
    %c0_i32_0 = arith.constant 0 : i32
    %c0_i32_1 = arith.constant 0 : i32
    return %arg0, %arg1, %c0_i32, %c0_i32_0 : i32, i32, i32, i32
  }
}

</mosaic_0001>

<bundles_post_ra>
// kernel: cross_entropy_loss.1
= control target key start
LH: loop header
LB: loop body
LE: loop exit
PB: predicated region body
PF: predicated region fallthrough
CT: control target
= control target key end

     0   :  { %s454_s9 = smov 0   ;;  %s456_s10 = smov 0   ;;  %s508_s0 = inlined_call_operand.vmem [shape: f32[2,4,2,128], index: 0, kind: input, shape index: {}]   ;;  %s509_s1 = inlined_call_operand.vmem [shape: s8[2,2,128], index: 1, kind: input, shape index: {}]   ;;  %s510_s2 = inlined_call_operand.vmem [shape: f32[2,1,1,128], index: 2, kind: output, shape index: {}]  }
   0x1   :  { %s458_s11 = smov 0  }
   0x2 LB: > { %s31_s12 = sadd.s32 1, %s432_s10  ;;  %p373_p0 = scmp.ge.s32.totalorder %s436_s11, 1  ;;  %s436_s11 = sphi %s458_s11, %s12_s11   ;;  %s432_s10 = sphi %s456_s10, %s512_s10   ;;  %s428_s9 = sphi %s454_s9, %s511_s9  }
   0x3   : > { %p33_p1 = scmp.ge.s32.totalorder %s31_s12, 2  ;;  %p159_p2 = scmp.lt.s32.totalorder %s436_s11, 3 }
   0x5   : > { %s514_s12 = smov (%p33_p1, %s31_s12), 0  ;;  %p160_p3 = pnand %p373_p0, %p159_p2 }
   0x6   : > { %p194_p4 = scmp.lt.s32.totalorder (!%p160_p3), %s428_s9, 1 }
   0x7   : > { %163 = sbr.rel (%p160_p3) target bundleno = 68 (0x44), region = 28 }
   0xc   : > { %s516_s9 = smov (!%p194_p4, %s428_s9), 1  ;;  %vm228_vm0 = vcmask 1041408   ;;  %v438_v0 = vmov 0.0  }
   0xd   : > { %s378_s13 = sshll.u32 %s516_s9, 3  ;;  %s478_s19 = scalar_lea.vmem %s510_s2, %s516_s9 }
   0xe   : > { %s201_s16 = scalar_lea.vmem %s508_s0, %s378_s13  ;;  %221 = vst [vmem:[%s478_s19] sm:$0x1] %v438_v0  ;;  %s209_s22 = scalar_lea.vmem %s509_s1, %s516_s9 }
   0xf   : > { %v222_v1 = vld [vmem:[%s201_s16] sm:$0x3]  ;;  %v223_v2 = vld [vmem:[%s201_s16 + $0x2] sm:$0x3]  ;;  %v224_v3 = vld [vmem:[%s201_s16 + $0x4] sm:$0x3] }
  0x10   : > { %v225_v4 = vld [vmem:[%s201_s16 + $0x6] sm:$0x3]  ;;  %v229_v5 = vsel %vm228_vm0, %v222_v1, -inf  ;;  %v230_v6 = vsel %vm228_vm0, %v223_v2, -inf  ;;  %v231_v7 = vsel %vm228_vm0, %v224_v3, -inf }
  0x11   : > { %v232_v8 = vsel %vm228_vm0, %v225_v4, -inf  ;;  %v233_v9 = vmax.f32 %v229_v5, %v230_v6  ;;  %v226_v12 = vld [vmem:[%s209_s22] sm:$0x1] }
  0x12   : > { %v234_v10 = vmax.f32 %v231_v7, %v232_v8  ;;  %v227_v20 = vunpack.c.0.s8 %v226_v12 }
  0x14   : > { %v235_v11 = vmax.f32 %v233_v9, %v234_v10  ;;  %vm255_vm1 = vcmp.eq.s32.totalorder %v227_v20, 0  ;;  %vm256_vm2 = vcmp.eq.s32.totalorder %v227_v20, 1  ;;  %vm257_vm3 = vcmp.eq.s32.totalorder %v227_v20, 2 }
  0x15   : > { %vm258_vm4 = vcmp.eq.s32.totalorder %v227_v20, 3  ;;  %v280_v53 = vld [vmem:[%s478_s19] sm:$0x1] }
  0x16   : > { %v236_v13 = vsub.f32 %v222_v1, %v235_v11  ;;  %v237_v14 = vsub.f32 %v223_v2, %v235_v11  ;;  %v238_v15 = vsub.f32 %v224_v3, %v235_v11  ;;  %v239_v16 = vsub.f32 %v225_v4, %v235_v11 }
  0x18   : > { %v240_v17 = vmul.f32 1.442695, %v236_v13  ;;  %v242_v18 = vmul.f32 1.442695, %v237_v14  ;;  %v244_v19 = vmul.f32 1.442695, %v238_v15 }
  0x19   : > { %v246_v21 = vmul.f32 1.442695, %v239_v16  ;;  %v259_v23 = vsel %vm255_vm1, %v236_v13, 0.0  ;;  %v260_v24 = vsel %vm256_vm2, %v237_v14, 0.0  ;;  %v261_v34 = vsel %vm257_vm3, %v238_v15, 0.0 }
  0x1a   : > { %404 = vpow2.f32 %v240_v17  ;;  %v263_v30 = vsel %vm228_vm0, %v259_v23, 0.0  ;;  %v264_v31 = vsel %vm228_vm0, %v260_v24, 0.0  ;;  %v266_v39 = vsel %vm228_vm0, %v261_v34, 0.0 }
  0x1b   : > { %406 = vpow2.f32 %v242_v18  ;;  %v265_v37 = vadd.f32 %v264_v31, %v263_v30  ;;  %v262_v40 = vsel %vm258_vm4, %v239_v16, 0.0 }
  0x1c   : > { %408 = vpow2.f32 %v244_v19  ;;  %v268_v42 = vsel %vm228_vm0, %v262_v40, 0.0 }
  0x1d   : > { %410 = vpow2.f32 %v246_v21  ;;  %v267_v41 = vadd.f32 %v266_v39, %v265_v37 }
  0x1f   : > { %v269_v43 = vadd.f32 %v268_v42, %v267_v41 }
  0x20   : > { %v405_v22 = vpop.eup %404 }
  0x21   : > { %v407_v25 = vpop.eup %406  ;;  %v248_v26 = vsel %vm228_vm0, %v405_v22, 0.0 }
  0x22   : > { %v409_v27 = vpop.eup %408  ;;  %v249_v28 = vsel %vm228_vm0, %v407_v25, 0.0 }
  0x23   : > { %v411_v29 = vpop.eup %410  ;;  %v250_v32 = vadd.f32 %v249_v28, %v248_v26  ;;  %v251_v33 = vsel %vm228_vm0, %v409_v27, 0.0 }
  0x24   : > { %v253_v35 = vsel %vm228_vm0, %v411_v29, 0.0 }
  0x25   : > { %v252_v36 = vadd.f32 %v251_v33, %v250_v32 }
  0x27   : > { %v254_v38 = vadd.f32 %v253_v35, %v252_v36 }
  0x29   : > { %412 = vlog2.f32 %v254_v38 }
  0x2f   : > { %v413_v44 = vpop.eup %412 }
  0x30   : > { %v271_v45 = vmul.f32 0.6931472, %v413_v44 }
  0x32   : > { %v272_v46 = vsub.f32 %v271_v45, %v269_v43 }
  0x34   : > { %v273_v47 = vsel %vm228_vm0, %v272_v46, 0.0 }
  0x35   : > { %v274_v48 = vrot.slane %v273_v47, 4 }
  0x37   : > { %v275_v49 = vadd.f32 %v274_v48, %v273_v47 }
  0x39   : > { %v276_v50 = vrot.slane %v275_v49, 2 }
  0x3b   : > { %v277_v51 = vadd.f32 %v276_v50, %v275_v49 }
  0x3d   : > { %v278_v52 = vrot.slane %v277_v51, 1 }
  0x3f   : > { %v279_v54 = vadd.f32 %v278_v52, %v277_v51 }
  0x41   : > { %v281_v55 = vadd.f32 %v280_v53, %v279_v54 }
  0x43   : > { %282 = vst [vmem:[%s478_s19] sm:$0x1] %v281_v55 }
  0x44 PF: > { %s12_s11 = sadd.s32 1, %s436_s11   ;;  %s511_s9 = smov %s432_s10 }
  0x45   : > { %p9_p5 = scmp.ge.s32.totalorder %s12_s11, 4   ;;  %s512_s10 = smov %s514_s12 }
  0x47   :  { %11 = sbr.rel (!%p9_p5) target bundleno = 2 (0x2), region = 65 }

</bundles_post_ra>
